<compile_context>
chip_gen: v6e
topology: v6e:2x2x1
jax: 0.10.0
libtpu: 0.0.40
codegen_flags: <defaults>
</compile_context>

<pallas_src>
import jax
import jax.numpy as jnp
from jax.experimental import pallas as pl
from jax.experimental.pallas import tpu as pltpu


def spectral_mul_kernel(xr_ref, xi_ref, wr_ref, wi_ref, or_ref, oi_ref):
    # xr/xi: (B, Cin, TM)   wr/wi: (Cin, Cout, TM)   or/oi: (B, Cout, TM); TM lane-dense.
    xr = xr_ref[...]
    xi = xi_ref[...]
    wr = wr_ref[...]
    wi = wi_ref[...]
    b, cin, tm = xr.shape
    cout = wr.shape[1]
    acc_r = jnp.zeros((b, cout, tm), jnp.float32)
    acc_i = jnp.zeros((b, cout, tm), jnp.float32)
    # Cin contraction as VPU FMAs over the lane (mode) axis. Statically unrolled —
    # intended for small channel counts (Cin*Cout up to ~1K).
    # TODO(synk): for large Cin/Cout switch to an MXU formulation with real/imag
    # folded into the sublane axis instead of this VPU loop.
    for i in range(cin):
        xri = xr[:, i, :][:, None, :]          # (B, 1, TM)
        xii = xi[:, i, :][:, None, :]
        wri = wr[i, :, :][None, :, :]          # (1, Cout, TM)
        wii = wi[i, :, :][None, :, :]
        acc_r = acc_r + xri * wri - xii * wii  # Re[(xr+i xi)(wr+i wi)]
        acc_i = acc_i + xri * wii + xii * wri  # Im[(xr+i xi)(wr+i wi)]
    or_ref[...] = acc_r.astype(or_ref.dtype)
    oi_ref[...] = acc_i.astype(oi_ref.dtype)


def _mode_tiling(modes1, modes2, tile_m=512):
    """Choose the mode-axis tile (multiple of 128) and padded M (multiple of the tile)."""
    M = modes1 * modes2
    m128 = -(-M // 128) * 128                               # lane-dense padding
    tm = max(128, (min(tile_m, m128) // 128) * 128)
    # Prefer >= 2 grid steps when M allows it: v7x megacore sharding + DMA/compute overlap.
    if m128 >= 256 and tm > m128 // 2:
        tm = max(128, ((m128 // 2) // 128) * 128)
    m_pad = -(-m128 // tm) * tm                             # no partially padded last tile
    return M, m_pad, tm


def _spectral_mode_matmul(xr, xi, wr, wi, tm):
    """Batched complex contraction over retained Fourier modes (lane axis = modes).

    xr, xi: (B, Cin, M_pad) f32;  wr, wi: (Cin, Cout, M_pad) f32
    returns (out_r, out_i): (B, Cout, M_pad) f32
    """
    B, Cin, M_pad = xr.shape
    Cout = wr.shape[1]
    assert M_pad % tm == 0
    grid = (M_pad // tm,)

    # 4 real mults + 4 adds per complex MAC.
    flops = 8 * M_pad * B * Cin * Cout
    bytes_accessed = 4 * M_pad * (2 * B * Cin + 2 * Cin * Cout + 2 * B * Cout)

    # Double-buffered per-step working set + headroom, capped below v7x's 64 MiB VMEM.
    per_step = 4 * tm * (2 * B * Cin + 2 * Cin * Cout + 2 * B * Cout)
    vmem_bytes = int(min(48 * 1024 * 1024,
                         max(16 * 1024 * 1024, 2 * per_step + (4 << 20))))

    x_spec = pl.BlockSpec((B, Cin, tm), lambda i: (0, 0, i))
    w_spec = pl.BlockSpec((Cin, Cout, tm), lambda i: (0, 0, i))
    o_spec = pl.BlockSpec((B, Cout, tm), lambda i: (0, 0, i))

    return pl.pallas_call(
        spectral_mul_kernel,
        out_shape=(jax.ShapeDtypeStruct((B, Cout, M_pad), jnp.float32),
                   jax.ShapeDtypeStruct((B, Cout, M_pad), jnp.float32)),
        grid_spec=pltpu.PrefetchScalarGridSpec(
            num_scalar_prefetch=0,
            grid=grid,
            in_specs=[x_spec, x_spec, w_spec, w_spec],
            out_specs=[o_spec, o_spec],
        ),
        compiler_params=pltpu.CompilerParams(
            dimension_semantics=("parallel",),
            vmem_limit_bytes=vmem_bytes,
        ),
        cost_estimate=pl.CostEstimate(
            flops=flops, transcendentals=0, bytes_accessed=bytes_accessed),
    )(xr, xi, wr, wi)


def init_spectral_weights(key, in_channels, out_channels, modes1, modes2, *, tile_m=512):
    """Deterministic init matching scale * randn(Cin, Cout, m1, m2, cfloat).

    Returns:
      (wr, wi):     weights in the PyTorch layout (Cin, Cout, m1, m2) (reference math)
      (wr_k, wi_k): weights arranged ONCE in the padded kernel layout (Cin, Cout, M_pad)
    """
    scale = 1.0 / (in_channels * out_channels)
    kr, ki = jax.random.split(key)
    wr = scale * jax.random.normal(kr, (in_channels, out_channels, modes1, modes2), jnp.float32)
    wi = scale * jax.random.normal(ki, (in_channels, out_channels, modes1, modes2), jnp.float32)
    M, M_pad, _ = _mode_tiling(modes1, modes2, tile_m)
    pad = ((0, 0), (0, 0), (0, M_pad - M))
    wr_k = jnp.pad(wr.reshape(in_channels, out_channels, M), pad)
    wi_k = jnp.pad(wi.reshape(in_channels, out_channels, M), pad)
    # TODO(synk): for memory-bound large-channel configs store wr_k/wi_k in bf16 and
    # upcast in-kernel to halve weight DMA; kept f32 here for an exact reference check.
    return (wr, wi), (wr_k, wi_k)


def spectral_conv2d(x, wr_k, wi_k, modes1, modes2, *, tile_m=512):
    """x: (B, Cin, H, W) f32; wr_k/wi_k: (Cin, Cout, M_pad) f32 from init_spectral_weights."""
    B, Cin, H, W = x.shape
    Wh = W // 2 + 1
    Cout = wr_k.shape[1]
    M, M_pad, tm = _mode_tiling(modes1, modes2, tile_m)
    assert wr_k.shape == (Cin, Cout, M_pad) and wi_k.shape == (Cin, Cout, M_pad)

    # TODO(synk): FFTs stay in XLA — no Pallas FFT primitive.
    x_ft = jnp.fft.rfft2(x, norm='ortho')                     # (B, Cin, H, Wh) complex64
    x_modes = x_ft[:, :, :modes1, :modes2]                    # (B, Cin, m1, m2)

    # Modes already trail (lane-dense, same order as the FFT output): reshape + zero-pad
    # to M_pad only — no transposes around the kernel.
    pad = ((0, 0), (0, 0), (0, M_pad - M))
    xr = jnp.pad(jnp.real(x_modes).reshape(B, Cin, M), pad)
    xi = jnp.pad(jnp.imag(x_modes).reshape(B, Cin, M), pad)

    # NOTE: for tiny problems XLA's fused einsum beats the pallas_call launch overhead;
    # the Pallas path is kept unconditional here so the kernel is always exercised.
    out_r, out_i = _spectral_mode_matmul(xr, xi, wr_k, wi_k, tm)

    out_modes = jax.lax.complex(out_r[:, :, :M],
                                out_i[:, :, :M]).reshape(B, Cout, modes1, modes2)
    # Single write of the full spectrum (pad of the corner, no zeros+scatter).
    out_ft = jnp.pad(out_modes, ((0, 0), (0, 0), (0, H - modes1), (0, Wh - modes2)))
    return jnp.fft.irfft2(out_ft, s=(H, W), norm='ortho')     # (B, Cout, H, W) float32


if __name__ == "__main__":
    key = jax.random.PRNGKey(0)
    xk, wk = jax.random.split(key)

    B, Cin, Cout = 2, 4, 4
    H = W = 16
    modes1, modes2 = 8, 8          # modes2 <= W//2 + 1 = 9

    x = jax.random.normal(xk, (B, Cin, H, W), jnp.float32)
    (wr, wi), (wr_k, wi_k) = init_spectral_weights(wk, Cin, Cout, modes1, modes2)

    fwd = jax.jit(lambda xx: spectral_conv2d(xx, wr_k, wi_k, modes1, modes2))
    y = jax.block_until_ready(fwd(x))

    # Pure-JAX reference of the PyTorch forward (same weights, PyTorch layout).
    x_ft = jnp.fft.rfft2(x, norm='ortho')
    w_c = wr + 1j * wi                                         # (Cin, Cout, m1, m2) complex64
    ref_modes = jnp.einsum('bixy,ioxy->boxy', x_ft[:, :, :modes1, :modes2], w_c)
    out_ft_ref = jnp.zeros((B, Cout, H, W // 2 + 1), jnp.complex64)
    out_ft_ref = out_ft_ref.at[:, :, :modes1, :modes2].set(ref_modes)
    y_ref = jnp.fft.irfft2(out_ft_ref, s=(H, W), norm='ortho')

    assert y.shape == (B, Cout, H, W)
    err = float(jnp.max(jnp.abs(y - y_ref)))
    assert jnp.allclose(y, y_ref, atol=1e-5, rtol=1e-4), err

    print("KERNEL_OK")
</pallas_src>

<mosaic_0001>
module attributes {stable_mosaic.version = 11 : i64} {
  func.func @spectral_mul_kernel(%arg0: i32, %arg1: memref<2x4x128xf32, #tpu.memory_space<vmem>>, %arg2: memref<2x4x128xf32, #tpu.memory_space<vmem>>, %arg3: memref<4x4x128xf32, #tpu.memory_space<vmem>>, %arg4: memref<4x4x128xf32, #tpu.memory_space<vmem>>, %arg5: memref<2x4x128xf32, #tpu.memory_space<vmem>>, %arg6: memref<2x4x128xf32, #tpu.memory_space<vmem>>) attributes {dimension_semantics = [#tpu.dimension_semantics<parallel>], iteration_bounds = array<i64: 1>, scalar_prefetch = 0 : i64, scratch_operands = 0 : i64, tpu.core_type = #tpu.core_type<tc>, window_params = [{transform_indices = @transform_0, window_bounds = array<i64: 2, 4, 128>}, {transform_indices = @transform_1, window_bounds = array<i64: 2, 4, 128>}, {transform_indices = @transform_2, window_bounds = array<i64: 4, 4, 128>}, {transform_indices = @transform_3, window_bounds = array<i64: 4, 4, 128>}, {transform_indices = @transform_4, window_bounds = array<i64: 2, 4, 128>}, {transform_indices = @transform_5, window_bounds = array<i64: 2, 4, 128>}]} {
    %c0 = arith.constant 0 : index
    %c0_0 = arith.constant 0 : index
    %c0_1 = arith.constant 0 : index
    %0 = vector.load %arg1[%c0, %c0_0, %c0_1] : memref<2x4x128xf32, #tpu.memory_space<vmem>>, vector<2x4x128xf32>
    %c0_2 = arith.constant 0 : index
    %c0_3 = arith.constant 0 : index
    %c0_4 = arith.constant 0 : index
    %1 = vector.load %arg2[%c0_2, %c0_3, %c0_4] : memref<2x4x128xf32, #tpu.memory_space<vmem>>, vector<2x4x128xf32>
    %c0_5 = arith.constant 0 : index
    %c0_6 = arith.constant 0 : index
    %c0_7 = arith.constant 0 : index
    %2 = vector.load %arg3[%c0_5, %c0_6, %c0_7] : memref<4x4x128xf32, #tpu.memory_space<vmem>>, vector<4x4x128xf32>
    %c0_8 = arith.constant 0 : index
    %c0_9 = arith.constant 0 : index
    %c0_10 = arith.constant 0 : index
    %3 = vector.load %arg4[%c0_8, %c0_9, %c0_10] : memref<4x4x128xf32, #tpu.memory_space<vmem>>, vector<4x4x128xf32>
    %cst = arith.constant 0.000000e+00 : f32
    %4 = vector.broadcast %cst : f32 to vector<2x4x128xf32>
    %cst_11 = arith.constant 0.000000e+00 : f32
    %5 = vector.broadcast %cst_11 : f32 to vector<2x4x128xf32>
    %6 = vector.extract_strided_slice %0 {offsets = [0, 0, 0], sizes = [2, 1, 128], strides = [1, 1, 1]} : vector<2x4x128xf32> to vector<2x1x128xf32>
    %7 = vector.shape_cast %6 : vector<2x1x128xf32> to vector<2x128xf32>
    %8 = vector.shape_cast %7 : vector<2x128xf32> to vector<2x1x128xf32>
    %9 = vector.extract_strided_slice %1 {offsets = [0, 0, 0], sizes = [2, 1, 128], strides = [1, 1, 1]} : vector<2x4x128xf32> to vector<2x1x128xf32>
    %10 = vector.shape_cast %9 : vector<2x1x128xf32> to vector<2x128xf32>
    %11 = vector.shape_cast %10 : vector<2x128xf32> to vector<2x1x128xf32>
    %12 = vector.extract_strided_slice %2 {offsets = [0, 0, 0], sizes = [1, 4, 128], strides = [1, 1, 1]} : vector<4x4x128xf32> to vector<1x4x128xf32>
    %13 = vector.shape_cast %12 : vector<1x4x128xf32> to vector<4x128xf32>
    %14 = vector.shape_cast %13 : vector<4x128xf32> to vector<1x4x128xf32>
    %15 = vector.extract_strided_slice %3 {offsets = [0, 0, 0], sizes = [1, 4, 128], strides = [1, 1, 1]} : vector<4x4x128xf32> to vector<1x4x128xf32>
    %16 = vector.shape_cast %15 : vector<1x4x128xf32> to vector<4x128xf32>
    %17 = vector.shape_cast %16 : vector<4x128xf32> to vector<1x4x128xf32>
    %18 = vector.broadcast %8 : vector<2x1x128xf32> to vector<2x4x128xf32>
    %19 = vector.broadcast %14 : vector<1x4x128xf32> to vector<2x4x128xf32>
    %20 = arith.mulf %18, %19 : vector<2x4x128xf32>
    %21 = arith.addf %4, %20 : vector<2x4x128xf32>
    %22 = vector.broadcast %11 : vector<2x1x128xf32> to vector<2x4x128xf32>
    %23 = vector.broadcast %17 : vector<1x4x128xf32> to vector<2x4x128xf32>
    %24 = arith.mulf %22, %23 : vector<2x4x128xf32>
    %25 = arith.subf %21, %24 : vector<2x4x128xf32>
    %26 = vector.broadcast %8 : vector<2x1x128xf32> to vector<2x4x128xf32>
    %27 = vector.broadcast %17 : vector<1x4x128xf32> to vector<2x4x128xf32>
    %28 = arith.mulf %26, %27 : vector<2x4x128xf32>
    %29 = arith.addf %5, %28 : vector<2x4x128xf32>
    %30 = vector.broadcast %11 : vector<2x1x128xf32> to vector<2x4x128xf32>
    %31 = vector.broadcast %14 : vector<1x4x128xf32> to vector<2x4x128xf32>
    %32 = arith.mulf %30, %31 : vector<2x4x128xf32>
    %33 = arith.addf %29, %32 : vector<2x4x128xf32>
    %34 = vector.extract_strided_slice %0 {offsets = [0, 1, 0], sizes = [2, 1, 128], strides = [1, 1, 1]} : vector<2x4x128xf32> to vector<2x1x128xf32>
    %35 = vector.shape_cast %34 : vector<2x1x128xf32> to vector<2x128xf32>
    %36 = vector.shape_cast %35 : vector<2x128xf32> to vector<2x1x128xf32>
    %37 = vector.extract_strided_slice %1 {offsets = [0, 1, 0], sizes = [2, 1, 128], strides = [1, 1, 1]} : vector<2x4x128xf32> to vector<2x1x128xf32>
    %38 = vector.shape_cast %37 : vector<2x1x128xf32> to vector<2x128xf32>
    %39 = vector.shape_cast %38 : vector<2x128xf32> to vector<2x1x128xf32>
    %40 = vector.extract_strided_slice %2 {offsets = [1, 0, 0], sizes = [1, 4, 128], strides = [1, 1, 1]} : vector<4x4x128xf32> to vector<1x4x128xf32>
    %41 = vector.shape_cast %40 : vector<1x4x128xf32> to vector<4x128xf32>
    %42 = vector.shape_cast %41 : vector<4x128xf32> to vector<1x4x128xf32>
    %43 = vector.extract_strided_slice %3 {offsets = [1, 0, 0], sizes = [1, 4, 128], strides = [1, 1, 1]} : vector<4x4x128xf32> to vector<1x4x128xf32>
    %44 = vector.shape_cast %43 : vector<1x4x128xf32> to vector<4x128xf32>
    %45 = vector.shape_cast %44 : vector<4x128xf32> to vector<1x4x128xf32>
    %46 = vector.broadcast %36 : vector<2x1x128xf32> to vector<2x4x128xf32>
    %47 = vector.broadcast %42 : vector<1x4x128xf32> to vector<2x4x128xf32>
    %48 = arith.mulf %46, %47 : vector<2x4x128xf32>
    %49 = arith.addf %25, %48 : vector<2x4x128xf32>
    %50 = vector.broadcast %39 : vector<2x1x128xf32> to vector<2x4x128xf32>
    %51 = vector.broadcast %45 : vector<1x4x128xf32> to vector<2x4x128xf32>
    %52 = arith.mulf %50, %51 : vector<2x4x128xf32>
    %53 = arith.subf %49, %52 : vector<2x4x128xf32>
    %54 = vector.broadcast %36 : vector<2x1x128xf32> to vector<2x4x128xf32>
    %55 = vector.broadcast %45 : vector<1x4x128xf32> to vector<2x4x128xf32>
    %56 = arith.mulf %54, %55 : vector<2x4x128xf32>
    %57 = arith.addf %33, %56 : vector<2x4x128xf32>
    %58 = vector.broadcast %39 : vector<2x1x128xf32> to vector<2x4x128xf32>
    %59 = vector.broadcast %42 : vector<1x4x128xf32> to vector<2x4x128xf32>
    %60 = arith.mulf %58, %59 : vector<2x4x128xf32>
    %61 = arith.addf %57, %60 : vector<2x4x128xf32>
    %62 = vector.extract_strided_slice %0 {offsets = [0, 2, 0], sizes = [2, 1, 128], strides = [1, 1, 1]} : vector<2x4x128xf32> to vector<2x1x128xf32>
    %63 = vector.shape_cast %62 : vector<2x1x128xf32> to vector<2x128xf32>
    %64 = vector.shape_cast %63 : vector<2x128xf32> to vector<2x1x128xf32>
    %65 = vector.extract_strided_slice %1 {offsets = [0, 2, 0], sizes = [2, 1, 128], strides = [1, 1, 1]} : vector<2x4x128xf32> to vector<2x1x128xf32>
    %66 = vector.shape_cast %65 : vector<2x1x128xf32> to vector<2x128xf32>
    %67 = vector.shape_cast %66 : vector<2x128xf32> to vector<2x1x128xf32>
    %68 = vector.extract_strided_slice %2 {offsets = [2, 0, 0], sizes = [1, 4, 128], strides = [1, 1, 1]} : vector<4x4x128xf32> to vector<1x4x128xf32>
    %69 = vector.shape_cast %68 : vector<1x4x128xf32> to vector<4x128xf32>
    %70 = vector.shape_cast %69 : vector<4x128xf32> to vector<1x4x128xf32>
    %71 = vector.extract_strided_slice %3 {offsets = [2, 0, 0], sizes = [1, 4, 128], strides = [1, 1, 1]} : vector<4x4x128xf32> to vector<1x4x128xf32>
    %72 = vector.shape_cast %71 : vector<1x4x128xf32> to vector<4x128xf32>
    %73 = vector.shape_cast %72 : vector<4x128xf32> to vector<1x4x128xf32>
    %74 = vector.broadcast %64 : vector<2x1x128xf32> to vector<2x4x128xf32>
    %75 = vector.broadcast %70 : vector<1x4x128xf32> to vector<2x4x128xf32>
    %76 = arith.mulf %74, %75 : vector<2x4x128xf32>
    %77 = arith.addf %53, %76 : vector<2x4x128xf32>
    %78 = vector.broadcast %67 : vector<2x1x128xf32> to vector<2x4x128xf32>
    %79 = vector.broadcast %73 : vector<1x4x128xf32> to vector<2x4x128xf32>
    %80 = arith.mulf %78, %79 : vector<2x4x128xf32>
    %81 = arith.subf %77, %80 : vector<2x4x128xf32>
    %82 = vector.broadcast %64 : vector<2x1x128xf32> to vector<2x4x128xf32>
    %83 = vector.broadcast %73 : vector<1x4x128xf32> to vector<2x4x128xf32>
    %84 = arith.mulf %82, %83 : vector<2x4x128xf32>
    %85 = arith.addf %61, %84 : vector<2x4x128xf32>
    %86 = vector.broadcast %67 : vector<2x1x128xf32> to vector<2x4x128xf32>
    %87 = vector.broadcast %70 : vector<1x4x128xf32> to vector<2x4x128xf32>
    %88 = arith.mulf %86, %87 : vector<2x4x128xf32>
    %89 = arith.addf %85, %88 : vector<2x4x128xf32>
    %90 = vector.extract_strided_slice %0 {offsets = [0, 3, 0], sizes = [2, 1, 128], strides = [1, 1, 1]} : vector<2x4x128xf32> to vector<2x1x128xf32>
    %91 = vector.shape_cast %90 : vector<2x1x128xf32> to vector<2x128xf32>
    %92 = vector.shape_cast %91 : vector<2x128xf32> to vector<2x1x128xf32>
    %93 = vector.extract_strided_slice %1 {offsets = [0, 3, 0], sizes = [2, 1, 128], strides = [1, 1, 1]} : vector<2x4x128xf32> to vector<2x1x128xf32>
    %94 = vector.shape_cast %93 : vector<2x1x128xf32> to vector<2x128xf32>
    %95 = vector.shape_cast %94 : vector<2x128xf32> to vector<2x1x128xf32>
    %96 = vector.extract_strided_slice %2 {offsets = [3, 0, 0], sizes = [1, 4, 128], strides = [1, 1, 1]} : vector<4x4x128xf32> to vector<1x4x128xf32>
    %97 = vector.shape_cast %96 : vector<1x4x128xf32> to vector<4x128xf32>
    %98 = vector.shape_cast %97 : vector<4x128xf32> to vector<1x4x128xf32>
    %99 = vector.extract_strided_slice %3 {offsets = [3, 0, 0], sizes = [1, 4, 128], strides = [1, 1, 1]} : vector<4x4x128xf32> to vector<1x4x128xf32>
    %100 = vector.shape_cast %99 : vector<1x4x128xf32> to vector<4x128xf32>
    %101 = vector.shape_cast %100 : vector<4x128xf32> to vector<1x4x128xf32>
    %102 = vector.broadcast %92 : vector<2x1x128xf32> to vector<2x4x128xf32>
    %103 = vector.broadcast %98 : vector<1x4x128xf32> to vector<2x4x128xf32>
    %104 = arith.mulf %102, %103 : vector<2x4x128xf32>
    %105 = arith.addf %81, %104 : vector<2x4x128xf32>
    %106 = vector.broadcast %95 : vector<2x1x128xf32> to vector<2x4x128xf32>
    %107 = vector.broadcast %101 : vector<1x4x128xf32> to vector<2x4x128xf32>
    %108 = arith.mulf %106, %107 : vector<2x4x128xf32>
    %109 = arith.subf %105, %108 : vector<2x4x128xf32>
    %110 = vector.broadcast %92 : vector<2x1x128xf32> to vector<2x4x128xf32>
    %111 = vector.broadcast %101 : vector<1x4x128xf32> to vector<2x4x128xf32>
    %112 = arith.mulf %110, %111 : vector<2x4x128xf32>
    %113 = arith.addf %89, %112 : vector<2x4x128xf32>
    %114 = vector.broadcast %95 : vector<2x1x128xf32> to vector<2x4x128xf32>
    %115 = vector.broadcast %98 : vector<1x4x128xf32> to vector<2x4x128xf32>
    %116 = arith.mulf %114, %115 : vector<2x4x128xf32>
    %117 = arith.addf %113, %116 : vector<2x4x128xf32>
    %c0_12 = arith.constant 0 : index
    %c0_13 = arith.constant 0 : index
    %c0_14 = arith.constant 0 : index
    %118 = vector.load %arg5[%c0_12, %c0_13, %c0_14] : memref<2x4x128xf32, #tpu.memory_space<vmem>>, vector<2x4x128xf32>
    tpu.vector_store %arg5[%c0_12, %c0_13, %c0_14], %109 {strides = array<i32>} : memref<2x4x128xf32, #tpu.memory_space<vmem>>, vector<2x4x128xf32>,
    %c0_15 = arith.constant 0 : index
    %c0_16 = arith.constant 0 : index
    %c0_17 = arith.constant 0 : index
    %119 = vector.load %arg6[%c0_15, %c0_16, %c0_17] : memref<2x4x128xf32, #tpu.memory_space<vmem>>, vector<2x4x128xf32>
    tpu.vector_store %arg6[%c0_15, %c0_16, %c0_17], %117 {strides = array<i32>} : memref<2x4x128xf32, #tpu.memory_space<vmem>>, vector<2x4x128xf32>,
    return
  }
  func.func @transform_0(%arg0: i32) -> (i32, i32, i32) {
    %c0_i32 = arith.constant 0 : i32
    %c0_i32_0 = arith.constant 0 : i32
    %c0_i32_1 = arith.constant 0 : i32
    return %c0_i32, %c0_i32_0, %arg0 : i32, i32, i32
  }
  func.func @transform_1(%arg0: i32) -> (i32, i32, i32) {
    %c0_i32 = arith.constant 0 : i32
    %c0_i32_0 = arith.constant 0 : i32
    %c0_i32_1 = arith.constant 0 : i32
    return %c0_i32, %c0_i32_0, %arg0 : i32, i32, i32
  }
  func.func @transform_2(%arg0: i32) -> (i32, i32, i32) {
    %c0_i32 = arith.constant 0 : i32
    %c0_i32_0 = arith.constant 0 : i32
    %c0_i32_1 = arith.constant 0 : i32
    return %c0_i32, %c0_i32_0, %arg0 : i32, i32, i32
  }
  func.func @transform_3(%arg0: i32) -> (i32, i32, i32) {
    %c0_i32 = arith.constant 0 : i32
    %c0_i32_0 = arith.constant 0 : i32
    %c0_i32_1 = arith.constant 0 : i32
    return %c0_i32, %c0_i32_0, %arg0 : i32, i32, i32
  }
  func.func @transform_4(%arg0: i32) -> (i32, i32, i32) {
    %c0_i32 = arith.constant 0 : i32
    %c0_i32_0 = arith.constant 0 : i32
    %c0_i32_1 = arith.constant 0 : i32
    return %c0_i32, %c0_i32_0, %arg0 : i32, i32, i32
  }
  func.func @transform_5(%arg0: i32) -> (i32, i32, i32) {
    %c0_i32 = arith.constant 0 : i32
    %c0_i32_0 = arith.constant 0 : i32
    %c0_i32_1 = arith.constant 0 : i32
    return %c0_i32, %c0_i32_0, %arg0 : i32, i32, i32
  }
}

</mosaic_0001>

<bundles_post_ra>
// kernel: reverse.1
= control target key start
LH: loop header
LB: loop body
LE: loop exit
PB: predicated region body
PF: predicated region fallthrough
CT: control target
= control target key end

     0   :  { %v72_v3 = vlaneseq  ;;  %v65_v9 = vld [vmem:[#allocation0 + $0x7] ss:$-1 sm:$0xff]  ;;  %v79_v12 = vld [vmem:[#allocation0 + $0x17] ss:$-1 sm:$0xff]  ;;  %s331_s0 = inlined_call_operand.vmem [shape: f32[2,4,16,7], index: 0, kind: input, shape index: {}]   ;;  %s332_s1 = inlined_call_operand.vmem [shape: f32[2,4,16,7], index: 1, kind: output, shape index: {}]  }
   0x1   :  { %v45_v0 = vld [vmem:[%s331_s0] sm:$0xff]  ;;  %v47_v1 = vld [vmem:[%s331_s0 + $0x8] sm:$0xff]  ;;  %v49_v2 = vld [vmem:[%s331_s0 + $0x10] sm:$0xff]  ;;  %v66_v10 = vrot.slane %v65_v9, 1  ;;  %v80_v14 = vrot.slane %v79_v12, 1 }
   0x2   :  { %46 = vst [vmem:[#allocation0 + $0x8] sm:$0xff] %v45_v0  ;;  %48 = vst [vmem:[#allocation0 + $0x18] sm:$0xff] %v47_v1  ;;  %v51_v4 = vld [vmem:[%s331_s0 + $0x18] sm:$0xff]  ;;  %v53_v5 = vld [vmem:[%s331_s0 + $0x20] sm:$0xff]  ;;  %v73_v11 = vshrl.u32 %v72_v3, 7 }
   0x3   :  { %50 = vst [vmem:[#allocation0 + $0x28] sm:$0xff] %v49_v2  ;;  %v55_v6 = vld [vmem:[%s331_s0 + $0x28] sm:$0xff]  ;;  %52 = vst [vmem:[#allocation0 + $0x38] sm:$0xff] %v51_v4  ;;  %v57_v7 = vld [vmem:[%s331_s0 + $0x30] sm:$0xff] }
   0x4   :  { %54 = vst [vmem:[#allocation0 + $0x48] sm:$0xff] %v53_v5  ;;  %56 = vst [vmem:[#allocation0 + $0x58] sm:$0xff] %v55_v6  ;;  %v59_v8 = vld [vmem:[%s331_s0 + $0x38] sm:$0xff]  ;;  %v93_v13 = vld [vmem:[#allocation0 + $0x27] ss:$-1 sm:$0xff]  ;;  %vm74_vm0 = vcmp.lt.s32.totalorder %v73_v11, 7 }
   0x5   :  { %58 = vst [vmem:[#allocation0 + $0x68] sm:$0xff] %v57_v7  ;;  %60 = vst [vmem:[#allocation0 + $0x78] sm:$0xff] %v59_v8  ;;  %v94_v15 = vrot.slane %v93_v13, 1  ;;  %v107_v16 = vld [vmem:[#allocation0 + $0x37] ss:$-1 sm:$0xff] }
   0x6   :  { %67 = vst [vmem:[#allocation1] sm:$0xff] %v66_v10  ;;  %v108_v17 = vrot.slane %v107_v16, 1  ;;  %v121_v18 = vld [vmem:[#allocation0 + $0x47] ss:$-1 sm:$0xff]  ;;  %v135_v19 = vld [vmem:[#allocation0 + $0x57] ss:$-1 sm:$0xff] }
   0x7   :  { %81 = vst [vmem:[#allocation1 + $0x8] sm:$0xff] %v80_v14  ;;  %95 = vst [vmem:[#allocation1 + $0x10] sm:$0xff] %v94_v15  ;;  %v122_v20 = vrot.slane %v121_v18, 1  ;;  %v136_v21 = vrot.slane %v135_v19, 1  ;;  %v149_v22 = vld [vmem:[#allocation0 + $0x67] ss:$-1 sm:$0xff] }
   0x8   :  { %v163_v23 = vld [vmem:[#allocation0 + $0x77] ss:$-1 sm:$0xff]  ;;  %109 = vst [vmem:[#allocation1 + $0x18] sm:$0xff] %v108_v17  ;;  %v150_v24 = vrot.slane %v149_v22, 1 }
   0x9   :  { %v164_v25 = vrot.slane %v163_v23, 1  ;;  %v70_v26 = vld [vmem:[#allocation0 + $0xf] ss:$-1 sm:$0xff]  ;;  %v84_v27 = vld [vmem:[#allocation0 + $0x1f] ss:$-1 sm:$0xff]  ;;  %123 = vst [vmem:[#allocation1 + $0x20] sm:$0xff] %v122_v20 }
   0xa   :  { %v98_v28 = vld [vmem:[#allocation0 + $0x2f] ss:$-1 sm:$0xff]  ;;  %137 = vst [vmem:[#allocation1 + $0x28] sm:$0xff] %v136_v21  ;;  %v71_v29 = vrot.slane %v70_v26, 1  ;;  %v85_v30 = vrot.slane %v84_v27, 1  ;;  %151 = vst [vmem:[#allocation1 + $0x30] sm:$0xff] %v150_v24 }
   0xb   :  { %v99_v31 = vrot.slane %v98_v28, 1  ;;  %v112_v32 = vld [vmem:[#allocation0 + $0x3f] ss:$-1 sm:$0xff]  ;;  %165 = vst [vmem:[#allocation1 + $0x38] sm:$0xff] %v164_v25  ;;  %v126_v34 = vld [vmem:[#allocation0 + $0x4f] ss:$-1 sm:$0xff] }
   0xc   :  { %v113_v33 = vrot.slane %v112_v32, 1  ;;  %v140_v35 = vld [vmem:[#allocation0 + $0x5f] ss:$-1 sm:$0xff]  ;;  %75 = vst.msk [vmem:[#allocation1] sm:$0xff] %vm74_vm0, %v71_v29  ;;  %89 = vst.msk [vmem:[#allocation1 + $0x8] sm:$0xff] %vm74_vm0, %v85_v30  ;;  %v127_v36 = vrot.slane %v126_v34, 1 }
   0xd   :  { %103 = vst.msk [vmem:[#allocation1 + $0x10] sm:$0xff] %vm74_vm0, %v99_v31  ;;  %v141_v37 = vrot.slane %v140_v35, 1  ;;  %v154_v38 = vld [vmem:[#allocation0 + $0x6f] ss:$-1 sm:$0xff]  ;;  %v168_v39 = vld [vmem:[#allocation0 + $0x7f] ss:$-1 sm:$0xff] }
   0xe   :  { %117 = vst.msk [vmem:[#allocation1 + $0x18] sm:$0xff] %vm74_vm0, %v113_v33  ;;  %v155_v40 = vrot.slane %v154_v38, 1  ;;  %v169_v41 = vrot.slane %v168_v39, 1  ;;  %131 = vst.msk [vmem:[#allocation1 + $0x20] sm:$0xff] %vm74_vm0, %v127_v36 }
   0xf   :  { %145 = vst.msk [vmem:[#allocation1 + $0x28] sm:$0xff] %vm74_vm0, %v141_v37 }
  0x10   :  { %159 = vst.msk [vmem:[#allocation1 + $0x30] sm:$0xff] %vm74_vm0, %v155_v40  ;;  %173 = vst.msk [vmem:[#allocation1 + $0x38] sm:$0xff] %vm74_vm0, %v169_v41 }
  0x13   :  { %v216_v42 = vld [vmem:[#allocation1] sm:$0xff]  ;;  %v218_v43 = vld [vmem:[#allocation1 + $0x8] sm:$0xff] }
  0x14   :  { %v220_v44 = vld [vmem:[#allocation1 + $0x10] sm:$0xff]  ;;  %217 = vst [vmem:[%s332_s1] sm:$0xff] %v216_v42  ;;  %219 = vst [vmem:[%s332_s1 + $0x8] sm:$0xff] %v218_v43 }
  0x15   :  { %221 = vst [vmem:[%s332_s1 + $0x10] sm:$0xff] %v220_v44  ;;  %v222_v45 = vld [vmem:[#allocation1 + $0x18] sm:$0xff]  ;;  %v224_v46 = vld [vmem:[#allocation1 + $0x20] sm:$0xff] }
  0x16   :  { %223 = vst [vmem:[%s332_s1 + $0x18] sm:$0xff] %v222_v45  ;;  %v226_v47 = vld [vmem:[#allocation1 + $0x28] sm:$0xff]  ;;  %225 = vst [vmem:[%s332_s1 + $0x20] sm:$0xff] %v224_v46 }
  0x17   :  { %227 = vst [vmem:[%s332_s1 + $0x28] sm:$0xff] %v226_v47  ;;  %v228_v48 = vld [vmem:[#allocation1 + $0x30] sm:$0xff]  ;;  %v230_v49 = vld [vmem:[#allocation1 + $0x38] sm:$0xff] }
  0x18   :  { %229 = vst [vmem:[%s332_s1 + $0x30] sm:$0xff] %v228_v48  ;;  %231 = vst [vmem:[%s332_s1 + $0x38] sm:$0xff] %v230_v49 }

// kernel: _lambda_.1
= control target key start
LH: loop header
LB: loop body
LE: loop exit
PB: predicated region body
PF: predicated region fallthrough
CT: control target
= control target key end

     0   :  { %v31_v0 = vlaneseq  ;;  %s261_s0 = inlined_call_operand.vmem [shape: f32[2,4,128], index: 0, kind: input, shape index: {}]   ;;  %s262_s1 = inlined_call_operand.vmem [shape: f32[2,4,128], index: 1, kind: input, shape index: {}]   ;;  %s263_s2 = inlined_call_operand.vmem [shape: f32[4,4,128], index: 2, kind: input, shape index: {}]   ;;  %s264_s3 = inlined_call_operand.vmem [shape: f32[4,4,128], index: 3, kind: input, shape index: {}]   ;;  %s265_s4 = inlined_call_operand.vmem [shape: f32[2,4,128], index: 4, kind: output, shape index: {0}]   ;;  %s266_s5 = inlined_call_operand.vmem [shape: f32[2,4,128], index: 5, kind: output, shape index: {1}]  }
   0x1   :  { %v19_v2 = vld [vmem:[%s261_s0] sm:$0xf]  ;;  %v24_v8 = vld [vmem:[%s263_s2 + $0x4] sm:$0xf]  ;;  %v225_v18 = vld [vmem:[%s263_s2 + $0x8] sm:$0xf] }
   0x2   :  { %v32_v1 = vshrl.u32 %v31_v0, 7  ;;  %v21_v3 = vld [vmem:[%s262_s1] sm:$0xf]  ;;  %v20_v16 = vld [vmem:[%s261_s0 + $0x4] sm:$0xf] }
   0x3   :  { %v23_v4 = vld [vmem:[%s263_s2] sm:$0xf]  ;;  %v22_v17 = vld [vmem:[%s262_s1 + $0x4] sm:$0xf]  ;;  %v233_v27 = vld [vmem:[%s263_s2 + $0xc] sm:$0xf] }
   0x4   :  { %v33_v5 = vsub.s32 0, %v32_v1  ;;  %v65_v6 = vsub.s32 1, %v32_v1  ;;  %v97_v7 = vsub.s32 2, %v32_v1  ;;  %v27_v9 = vld [vmem:[%s264_s3] sm:$0xf]  ;;  %v129_v10 = vsub.s32 3, %v32_v1 }
   0x5   :  { %v28_v19 = vld [vmem:[%s264_s3 + $0x4] sm:$0xf]  ;;  %v29_v36 = vld [vmem:[%s264_s3 + $0x8] sm:$0xf]  ;;  %v30_v43 = vld [vmem:[%s264_s3 + $0xc] sm:$0xf] }
   0x6   :  { %v34_v11 = vrot.slane %v19_v2, %v33_v5  ;;  %v46_v12 = vrot.slane %v21_v3, %v33_v5  ;;  %v66_v13 = vrot.slane %v19_v2, %v65_v6  ;;  %v78_v14 = vrot.slane %v21_v3, %v65_v6 }
   0x7   :  { %v98_v15 = vrot.slane %v19_v2, %v97_v7  ;;  %v110_v24 = vrot.slane %v21_v3, %v97_v7  ;;  %v130_v25 = vrot.slane %v19_v2, %v129_v10  ;;  %v142_v26 = vrot.slane %v21_v3, %v129_v10 }
   0x8   :  { %v39_v20 = vmul.f32 %v34_v11, %v23_v4  ;;  %v51_v21 = vmul.f32 %v46_v12, %v27_v9  ;;  %v71_v22 = vmul.f32 %v66_v13, %v24_v8  ;;  %v83_v23 = vmul.f32 %v78_v14, %v28_v19 }
   0x9   :  { %v38_v29 = vrot.slane %v20_v16, %v33_v5  ;;  %v50_v30 = vrot.slane %v22_v17, %v33_v5  ;;  %v70_v31 = vrot.slane %v20_v16, %v65_v6  ;;  %v103_v32 = vmul.f32 %v98_v15, %v225_v18 }
   0xa   :  { %v53_v28 = vsub.f32 %v39_v20, %v51_v21  ;;  %v82_v33 = vrot.slane %v22_v17, %v65_v6  ;;  %v102_v34 = vrot.slane %v20_v16, %v97_v7  ;;  %v114_v35 = vrot.slane %v22_v17, %v97_v7 }
   0xb   :  { %v40_v38 = vmul.f32 %v38_v29, %v23_v4  ;;  %v52_v39 = vmul.f32 %v50_v30, %v27_v9  ;;  %v72_v40 = vmul.f32 %v70_v31, %v24_v8  ;;  %v115_v41 = vmul.f32 %v110_v24, %v29_v36 }
   0xc   :  { %v73_v37 = vadd.f32 %v71_v22, %v53_v28  ;;  %v135_v42 = vmul.f32 %v130_v25, %v233_v27  ;;  %v84_v46 = vmul.f32 %v82_v33, %v28_v19  ;;  %v55_v47 = vmul.f32 %v34_v11, %v27_v9 }
   0xd   :  { %v54_v45 = vsub.f32 %v40_v38, %v52_v39  ;;  %v147_v48 = vmul.f32 %v142_v26, %v30_v43  ;;  %v134_v49 = vrot.slane %v20_v16, %v129_v10  ;;  %v59_v50 = vmul.f32 %v46_v12, %v23_v4 }
   0xe   :  { %v85_v44 = vsub.f32 %v73_v37, %v83_v23  ;;  %v87_v51 = vmul.f32 %v66_v13, %v28_v19  ;;  %v104_v54 = vmul.f32 %v102_v34, %v225_v18  ;;  %v116_v55 = vmul.f32 %v114_v35, %v29_v36 }
   0xf   :  { %v74_v53 = vadd.f32 %v72_v40, %v54_v45  ;;  %v146_v56 = vrot.slane %v22_v17, %v129_v10  ;;  %v61_v57 = vadd.f32 %v59_v50, %v55_v47  ;;  %v91_v58 = vmul.f32 %v78_v14, %v24_v8 }
  0x10   :  { %v105_v52 = vadd.f32 %v103_v32, %v85_v44  ;;  %v56_v59 = vmul.f32 %v38_v29, %v27_v9  ;;  %v60_v62 = vmul.f32 %v50_v30, %v23_v4  ;;  %v88_v63 = vmul.f32 %v70_v31, %v28_v19 }
  0x11   :  { %v86_v61 = vsub.f32 %v74_v53, %v84_v46  ;;  %v136_v0 = vmul.f32 %v134_v49, %v233_v27  ;;  %v89_v1 = vadd.f32 %v87_v51, %v61_v57  ;;  %v119_v2 = vmul.f32 %v98_v15, %v29_v36 }
  0x12   :  { %v117_v60 = vsub.f32 %v105_v52, %v115_v41  ;;  %v62_v6 = vadd.f32 %v60_v62, %v56_v59  ;;  %v92_v7 = vmul.f32 %v82_v33, %v24_v8  ;;  %v148_v11 = vmul.f32 %v146_v56, %v30_v43 }
  0x13   :  { %v106_v5 = vadd.f32 %v104_v54, %v86_v61  ;;  %v93_v12 = vadd.f32 %v91_v58, %v89_v1  ;;  %v123_v13 = vmul.f32 %v110_v24, %v225_v18  ;;  %v120_v9 = vmul.f32 %v102_v34, %v29_v36 }
  0x14   :  { %v137_v3 = vadd.f32 %v135_v42, %v117_v60  ;;  %v90_v14 = vadd.f32 %v88_v63, %v62_v6  ;;  %v151_v20 = vmul.f32 %v130_v25, %v30_v43  ;;  %v124_v19 = vmul.f32 %v114_v35, %v225_v18 }
  0x15   :  { %v118_v16 = vsub.f32 %v106_v5, %v116_v55  ;;  %v121_v17 = vadd.f32 %v119_v2, %v93_v12  ;;  %v155_v8 = vmul.f32 %v142_v26, %v233_v27  ;;  %v152_v24 = vmul.f32 %v134_v49, %v30_v43 }
  0x16   :  { %v149_v10 = vsub.f32 %v137_v3, %v147_v48  ;;  %v94_v15 = vadd.f32 %v92_v7, %v90_v14  ;;  %v156_v29 = vmul.f32 %v146_v56, %v233_v27 }
  0x17   :  { %v138_v4 = vadd.f32 %v136_v0, %v118_v16  ;;  %v125_v21 = vadd.f32 %v123_v13, %v121_v17 }
  0x18   :  { %159 = vst [vmem:[%s265_s4] sm:$0xf] %v149_v10  ;;  %v122_v23 = vadd.f32 %v120_v9, %v94_v15 }
  0x19   :  { %v150_v22 = vsub.f32 %v138_v4, %v148_v11  ;;  %v153_v28 = vadd.f32 %v151_v20, %v125_v21 }
  0x1a   :  { %v126_v25 = vadd.f32 %v124_v19, %v122_v23 }
  0x1b   :  { %160 = vst [vmem:[%s265_s4 + $0x4] sm:$0xf] %v150_v22  ;;  %v157_v30 = vadd.f32 %v155_v8, %v153_v28 }
  0x1c   :  { %v154_v31 = vadd.f32 %v152_v24, %v126_v25 }
  0x1d   :  { %161 = vst [vmem:[%s266_s5] sm:$0xf] %v157_v30 }
  0x1e   :  { %v158_v18 = vadd.f32 %v156_v29, %v154_v31 }
  0x20   :  { %162 = vst [vmem:[%s266_s5 + $0x4] sm:$0xf] %v158_v18 }

</bundles_post_ra>
